<compile_context>
chip_gen: v7x
topology: tpu7x:2x2x1
jax: 0.10.0
libtpu: 0.0.40
codegen_flags: <defaults>
</compile_context>

<pallas_src>
import jax
import jax.numpy as jnp
from jax import lax
from jax.experimental import pallas as pl
from jax.experimental.pallas import tpu as pltpu  # noqa: F401  (TPU backend assumed)

# ----------------------------- model sizes -----------------------------
B = 2           # batch
T = 8           # sequence length of blue_obs
F = 16          # blue_obs feature dim
H_LSTM = 32     # lstm hidden size == lstm_out
IMG = 16        # image spatial size (IMG x IMG)
KH = KW = 3     # conv kernel
C_CNN = 32      # conv channels == cnn_out (conv -> relu -> global avg pool)
HIDDEN = 32     # hidden_dim of the final nn.Linear(lstm_out + cnn_out, hidden_dim)
P = IMG * IMG   # spatial positions per image


# ========================= single fused encoder kernel =========================
def encoder_kernel(x_ref, wih_ref, whh_ref, blstm_ref,
                   patches_ref, wcnn_ref, bconv_ref, pool_ref,
                   w1_ref, w2_ref, bfin_ref, out_ref):
    # ---------------- LSTM branch ----------------
    # Input projection hoisted out of the recurrence: one well-shaped
    # (T*B, F) @ (F, 4H) matmul with a lane-dense 128-wide output.
    xg = jnp.dot(x_ref[...], wih_ref[...],
                 preferred_element_type=jnp.float32) + blstm_ref[...]      # (T*B, 4H)
    h = jnp.zeros((B, H_LSTM), jnp.float32)
    c = jnp.zeros((B, H_LSTM), jnp.float32)
    for t in range(T):  # fully unrolled at trace time (T == 8); only h @ W_hh per step
        gates = xg[t * B:(t + 1) * B, :] + jnp.dot(
            h, whh_ref[...], preferred_element_type=jnp.float32)           # (B, 4H)
        # full-vreg transcendentals on the (otherwise idle) EUP, then slice results
        sg = jax.nn.sigmoid(gates)
        tg = jnp.tanh(gates)
        i_g = sg[:, 0 * H_LSTM:1 * H_LSTM]       # PyTorch gate order i, f, g, o
        f_g = sg[:, 1 * H_LSTM:2 * H_LSTM]
        g_g = tg[:, 2 * H_LSTM:3 * H_LSTM]
        o_g = sg[:, 3 * H_LSTM:4 * H_LSTM]
        c = f_g * c + i_g * g_g
        h = o_g * jnp.tanh(c)
    # h is the last hidden state (B, H_LSTM), kept in vregs (no HBM round-trip).

    # ---------------- CNN branch ----------------
    # conv(1->C, 3x3, SAME) as lane-dense im2col matmul: (C,9) @ (9, B*P) -> (C, B*P)
    feat = jnp.dot(wcnn_ref[...], patches_ref[...],
                   preferred_element_type=jnp.float32) + bconv_ref[...]    # (C, 512)
    feat = jnp.maximum(feat, 0.0)                                          # ReLU
    # global average pool per batch element: contract the 512-wide lane dim of both
    # operands (NT dot), giving pooled directly in (B, C) orientation.
    pooled = lax.dot_general(pool_ref[...], feat,
                             dimension_numbers=(((1,), (1,)), ((), ())),
                             preferred_element_type=jnp.float32)           # (B, C)

    # ---------------- fused concat + final Linear ----------------
    # cat((h, pooled), 1) @ W + b  ==  h @ W[:L] + pooled @ W[L:] + b
    out_ref[...] = (jnp.dot(h, w1_ref[...], preferred_element_type=jnp.float32)
                    + jnp.dot(pooled, w2_ref[...], preferred_element_type=jnp.float32)
                    + bfin_ref[...])


# =============================== full forward ================================
@jax.jit
def encoder_forward(blue_obs, image, params):
    # --- LSTM input: time-major rows so time step t occupies rows [t*B, (t+1)*B) ---
    x2d = jnp.transpose(blue_obs, (1, 0, 2)).reshape(T * B, F).astype(jnp.float32)

    # --- CNN input: SAME-pad + im2col (transposed: taps x positions) ---
    img = image.astype(jnp.float32)
    img_p = jnp.pad(img, ((0, 0), (1, 1), (1, 1)))
    taps = [img_p[:, ky:ky + IMG, kx:kx + IMG].reshape(-1)
            for ky in range(KH) for kx in range(KW)]
    patches_t = jnp.stack(taps, axis=0)                           # (9, B*P)
    w_cnn = params["w_conv"].reshape(C_CNN, KH * KW)              # OIHW -> (C, 9), tap = ky*3+kx
    pool = jnp.kron(jnp.eye(B, dtype=jnp.float32),
                    jnp.ones((1, P), jnp.float32) / P)            # (B, B*P)

    return pl.pallas_call(
        encoder_kernel,
        out_shape=jax.ShapeDtypeStruct((B, HIDDEN), jnp.float32),
    )(x2d,
      params["w_ih"], params["w_hh"], params["b_lstm"].reshape(1, -1),
      patches_t, w_cnn, params["b_conv"].reshape(-1, 1), pool,
      params["w_fin"][:H_LSTM], params["w_fin"][H_LSTM:],
      params["b_fin"].reshape(1, -1))


# ============================ pure-JAX reference =============================
def reference_forward(blue_obs, image, params):
    # LSTM encoder (last hidden state)
    h = jnp.zeros((B, H_LSTM), jnp.float32)
    c = jnp.zeros((B, H_LSTM), jnp.float32)
    for t in range(T):
        gates = (blue_obs[:, t, :] @ params["w_ih"]
                 + h @ params["w_hh"] + params["b_lstm"])
        i_g = jax.nn.sigmoid(gates[:, :H_LSTM])
        f_g = jax.nn.sigmoid(gates[:, H_LSTM:2 * H_LSTM])
        g_g = jnp.tanh(gates[:, 2 * H_LSTM:3 * H_LSTM])
        o_g = jax.nn.sigmoid(gates[:, 3 * H_LSTM:])
        c = f_g * c + i_g * g_g
        h = o_g * jnp.tanh(c)
    lstm_out = h
    # CNN encoder: conv(1->C, 3x3, SAME) -> ReLU -> global avg pool
    x = image[:, None, :, :]
    y = jax.lax.conv_general_dilated(
        x, params["w_conv"], window_strides=(1, 1), padding="SAME",
        dimension_numbers=("NCHW", "OIHW", "NCHW"))
    y = y + params["b_conv"][None, :, None, None]
    y = jnp.maximum(y, 0.0)
    cnn_out = jnp.mean(y, axis=(2, 3))
    # final linear over the concatenation
    return jnp.concatenate([lstm_out, cnn_out], axis=1) @ params["w_fin"] + params["b_fin"]


# ================================== main =====================================
if __name__ == "__main__":
    key = jax.random.PRNGKey(0)
    keys = jax.random.split(key, 10)

    params = {
        "w_ih": 0.1 * jax.random.normal(keys[0], (F, 4 * H_LSTM), jnp.float32),
        "w_hh": 0.1 * jax.random.normal(keys[1], (H_LSTM, 4 * H_LSTM), jnp.float32),
        "b_lstm": 0.1 * jax.random.normal(keys[2], (4 * H_LSTM,), jnp.float32),
        "w_conv": 0.1 * jax.random.normal(keys[3], (C_CNN, 1, KH, KW), jnp.float32),
        "b_conv": 0.1 * jax.random.normal(keys[4], (C_CNN,), jnp.float32),
        "w_fin": 0.1 * jax.random.normal(keys[5], (H_LSTM + C_CNN, HIDDEN), jnp.float32),
        "b_fin": 0.1 * jax.random.normal(keys[6], (HIDDEN,), jnp.float32),
    }

    blue_obs = jax.random.normal(keys[7], (B, T, F), jnp.float32)
    image = jax.random.normal(keys[8], (B, IMG, IMG), jnp.float32)

    out = jax.block_until_ready(encoder_forward(blue_obs, image, params))
    ref = jax.block_until_ready(reference_forward(blue_obs, image, params))

    assert out.shape == (B, HIDDEN), out.shape
    assert jnp.allclose(out, ref, atol=1e-3, rtol=1e-3), (
        f"max abs err {jnp.max(jnp.abs(out - ref))}")
    print("KERNEL_OK")
</pallas_src>

<mosaic_0001>
module attributes {stable_mosaic.version = 11 : i64} {
  func.func @encoder_kernel(%arg0: memref<16x16xf32, #tpu.memory_space<vmem>>, %arg1: memref<16x128xf32, #tpu.memory_space<vmem>>, %arg2: memref<32x128xf32, #tpu.memory_space<vmem>>, %arg3: memref<1x128xf32, #tpu.memory_space<vmem>>, %arg4: memref<9x512xf32, #tpu.memory_space<vmem>>, %arg5: memref<32x9xf32, #tpu.memory_space<vmem>>, %arg6: memref<32x1xf32, #tpu.memory_space<vmem>>, %arg7: memref<2x512xf32, #tpu.memory_space<vmem>>, %arg8: memref<32x32xf32, #tpu.memory_space<vmem>>, %arg9: memref<32x32xf32, #tpu.memory_space<vmem>>, %arg10: memref<1x32xf32, #tpu.memory_space<vmem>>, %arg11: memref<2x32xf32, #tpu.memory_space<vmem>>) attributes {dimension_semantics = [], scalar_prefetch = 0 : i64, scratch_operands = 0 : i64, tpu.core_type = #tpu.core_type<tc>} {
    %c0 = arith.constant 0 : index
    %c0_0 = arith.constant 0 : index
    %0 = vector.load %arg0[%c0, %c0_0] : memref<16x16xf32, #tpu.memory_space<vmem>>, vector<16x16xf32>
    %c0_1 = arith.constant 0 : index
    %c0_2 = arith.constant 0 : index
    %1 = vector.load %arg1[%c0_1, %c0_2] : memref<16x128xf32, #tpu.memory_space<vmem>>, vector<16x128xf32>
    %cst = arith.constant dense<0.000000e+00> : vector<16x128xf32>
    %2 = tpu.matmul %0, %1, %cst {dimension_numbers = #tpu.dot_dimension_numbers<[1], [0], [0], [1], [0, 0, 1, 1], [], []>} : vector<16x16xf32>, vector<16x128xf32>, vector<16x128xf32> -> vector<16x128xf32>
    %c0_3 = arith.constant 0 : index
    %c0_4 = arith.constant 0 : index
    %3 = vector.load %arg3[%c0_3, %c0_4] : memref<1x128xf32, #tpu.memory_space<vmem>>, vector<1x128xf32>
    %4 = vector.broadcast %3 : vector<1x128xf32> to vector<16x128xf32>
    %5 = arith.addf %2, %4 : vector<16x128xf32>
    %cst_5 = arith.constant 0.000000e+00 : f32
    %6 = vector.broadcast %cst_5 : f32 to vector<2x32xf32>
    %cst_6 = arith.constant 0.000000e+00 : f32
    %7 = vector.broadcast %cst_6 : f32 to vector<2x32xf32>
    %8 = vector.extract_strided_slice %5 {offsets = [0, 0], sizes = [2, 128], strides = [1, 1]} : vector<16x128xf32> to vector<2x128xf32>
    %c0_7 = arith.constant 0 : index
    %c0_8 = arith.constant 0 : index
    %9 = vector.load %arg2[%c0_7, %c0_8] : memref<32x128xf32, #tpu.memory_space<vmem>>, vector<32x128xf32>
    %cst_9 = arith.constant dense<0.000000e+00> : vector<2x128xf32>
    %10 = tpu.matmul %6, %9, %cst_9 {dimension_numbers = #tpu.dot_dimension_numbers<[1], [0], [0], [1], [0, 0, 1, 1], [], []>} : vector<2x32xf32>, vector<32x128xf32>, vector<2x128xf32> -> vector<2x128xf32>
    %11 = arith.addf %8, %10 : vector<2x128xf32>
    %12 = arith.negf %11 : vector<2x128xf32>
    %13 = math.exp %12 : vector<2x128xf32>
    %cst_10 = arith.constant 1.000000e+00 : f32
    %14 = vector.broadcast %cst_10 : f32 to vector<2x128xf32>
    %15 = arith.addf %14, %13 : vector<2x128xf32>
    %16 = arith.divf %14, %15 : vector<2x128xf32>
    %17 = math.tanh %11 : vector<2x128xf32>
    %18 = vector.extract_strided_slice %16 {offsets = [0, 0], sizes = [2, 32], strides = [1, 1]} : vector<2x128xf32> to vector<2x32xf32>
    %19 = vector.extract_strided_slice %16 {offsets = [0, 32], sizes = [2, 32], strides = [1, 1]} : vector<2x128xf32> to vector<2x32xf32>
    %20 = vector.extract_strided_slice %17 {offsets = [0, 64], sizes = [2, 32], strides = [1, 1]} : vector<2x128xf32> to vector<2x32xf32>
    %21 = vector.extract_strided_slice %16 {offsets = [0, 96], sizes = [2, 32], strides = [1, 1]} : vector<2x128xf32> to vector<2x32xf32>
    %22 = arith.mulf %19, %7 : vector<2x32xf32>
    %23 = arith.mulf %18, %20 : vector<2x32xf32>
    %24 = arith.addf %22, %23 : vector<2x32xf32>
    %25 = math.tanh %24 : vector<2x32xf32>
    %26 = arith.mulf %21, %25 : vector<2x32xf32>
    %27 = vector.extract_strided_slice %5 {offsets = [2, 0], sizes = [2, 128], strides = [1, 1]} : vector<16x128xf32> to vector<2x128xf32>
    %c0_11 = arith.constant 0 : index
    %c0_12 = arith.constant 0 : index
    %28 = vector.load %arg2[%c0_11, %c0_12] : memref<32x128xf32, #tpu.memory_space<vmem>>, vector<32x128xf32>
    %cst_13 = arith.constant dense<0.000000e+00> : vector<2x128xf32>
    %29 = tpu.matmul %26, %28, %cst_13 {dimension_numbers = #tpu.dot_dimension_numbers<[1], [0], [0], [1], [0, 0, 1, 1], [], []>} : vector<2x32xf32>, vector<32x128xf32>, vector<2x128xf32> -> vector<2x128xf32>
    %30 = arith.addf %27, %29 : vector<2x128xf32>
    %31 = arith.negf %30 : vector<2x128xf32>
    %32 = math.exp %31 : vector<2x128xf32>
    %cst_14 = arith.constant 1.000000e+00 : f32
    %33 = vector.broadcast %cst_14 : f32 to vector<2x128xf32>
    %34 = arith.addf %33, %32 : vector<2x128xf32>
    %35 = arith.divf %33, %34 : vector<2x128xf32>
    %36 = math.tanh %30 : vector<2x128xf32>
    %37 = vector.extract_strided_slice %35 {offsets = [0, 0], sizes = [2, 32], strides = [1, 1]} : vector<2x128xf32> to vector<2x32xf32>
    %38 = vector.extract_strided_slice %35 {offsets = [0, 32], sizes = [2, 32], strides = [1, 1]} : vector<2x128xf32> to vector<2x32xf32>
    %39 = vector.extract_strided_slice %36 {offsets = [0, 64], sizes = [2, 32], strides = [1, 1]} : vector<2x128xf32> to vector<2x32xf32>
    %40 = vector.extract_strided_slice %35 {offsets = [0, 96], sizes = [2, 32], strides = [1, 1]} : vector<2x128xf32> to vector<2x32xf32>
    %41 = arith.mulf %38, %24 : vector<2x32xf32>
    %42 = arith.mulf %37, %39 : vector<2x32xf32>
    %43 = arith.addf %41, %42 : vector<2x32xf32>
    %44 = math.tanh %43 : vector<2x32xf32>
    %45 = arith.mulf %40, %44 : vector<2x32xf32>
    %46 = vector.extract_strided_slice %5 {offsets = [4, 0], sizes = [2, 128], strides = [1, 1]} : vector<16x128xf32> to vector<2x128xf32>
    %c0_15 = arith.constant 0 : index
    %c0_16 = arith.constant 0 : index
    %47 = vector.load %arg2[%c0_15, %c0_16] : memref<32x128xf32, #tpu.memory_space<vmem>>, vector<32x128xf32>
    %cst_17 = arith.constant dense<0.000000e+00> : vector<2x128xf32>
    %48 = tpu.matmul %45, %47, %cst_17 {dimension_numbers = #tpu.dot_dimension_numbers<[1], [0], [0], [1], [0, 0, 1, 1], [], []>} : vector<2x32xf32>, vector<32x128xf32>, vector<2x128xf32> -> vector<2x128xf32>
    %49 = arith.addf %46, %48 : vector<2x128xf32>
    %50 = arith.negf %49 : vector<2x128xf32>
    %51 = math.exp %50 : vector<2x128xf32>
    %cst_18 = arith.constant 1.000000e+00 : f32
    %52 = vector.broadcast %cst_18 : f32 to vector<2x128xf32>
    %53 = arith.addf %52, %51 : vector<2x128xf32>
    %54 = arith.divf %52, %53 : vector<2x128xf32>
    %55 = math.tanh %49 : vector<2x128xf32>
    %56 = vector.extract_strided_slice %54 {offsets = [0, 0], sizes = [2, 32], strides = [1, 1]} : vector<2x128xf32> to vector<2x32xf32>
    %57 = vector.extract_strided_slice %54 {offsets = [0, 32], sizes = [2, 32], strides = [1, 1]} : vector<2x128xf32> to vector<2x32xf32>
    %58 = vector.extract_strided_slice %55 {offsets = [0, 64], sizes = [2, 32], strides = [1, 1]} : vector<2x128xf32> to vector<2x32xf32>
    %59 = vector.extract_strided_slice %54 {offsets = [0, 96], sizes = [2, 32], strides = [1, 1]} : vector<2x128xf32> to vector<2x32xf32>
    %60 = arith.mulf %57, %43 : vector<2x32xf32>
    %61 = arith.mulf %56, %58 : vector<2x32xf32>
    %62 = arith.addf %60, %61 : vector<2x32xf32>
    %63 = math.tanh %62 : vector<2x32xf32>
    %64 = arith.mulf %59, %63 : vector<2x32xf32>
    %65 = vector.extract_strided_slice %5 {offsets = [6, 0], sizes = [2, 128], strides = [1, 1]} : vector<16x128xf32> to vector<2x128xf32>
    %c0_19 = arith.constant 0 : index
    %c0_20 = arith.constant 0 : index
    %66 = vector.load %arg2[%c0_19, %c0_20] : memref<32x128xf32, #tpu.memory_space<vmem>>, vector<32x128xf32>
    %cst_21 = arith.constant dense<0.000000e+00> : vector<2x128xf32>
    %67 = tpu.matmul %64, %66, %cst_21 {dimension_numbers = #tpu.dot_dimension_numbers<[1], [0], [0], [1], [0, 0, 1, 1], [], []>} : vector<2x32xf32>, vector<32x128xf32>, vector<2x128xf32> -> vector<2x128xf32>
    %68 = arith.addf %65, %67 : vector<2x128xf32>
    %69 = arith.negf %68 : vector<2x128xf32>
    %70 = math.exp %69 : vector<2x128xf32>
    %cst_22 = arith.constant 1.000000e+00 : f32
    %71 = vector.broadcast %cst_22 : f32 to vector<2x128xf32>
    %72 = arith.addf %71, %70 : vector<2x128xf32>
    %73 = arith.divf %71, %72 : vector<2x128xf32>
    %74 = math.tanh %68 : vector<2x128xf32>
    %75 = vector.extract_strided_slice %73 {offsets = [0, 0], sizes = [2, 32], strides = [1, 1]} : vector<2x128xf32> to vector<2x32xf32>
    %76 = vector.extract_strided_slice %73 {offsets = [0, 32], sizes = [2, 32], strides = [1, 1]} : vector<2x128xf32> to vector<2x32xf32>
    %77 = vector.extract_strided_slice %74 {offsets = [0, 64], sizes = [2, 32], strides = [1, 1]} : vector<2x128xf32> to vector<2x32xf32>
    %78 = vector.extract_strided_slice %73 {offsets = [0, 96], sizes = [2, 32], strides = [1, 1]} : vector<2x128xf32> to vector<2x32xf32>
    %79 = arith.mulf %76, %62 : vector<2x32xf32>
    %80 = arith.mulf %75, %77 : vector<2x32xf32>
    %81 = arith.addf %79, %80 : vector<2x32xf32>
    %82 = math.tanh %81 : vector<2x32xf32>
    %83 = arith.mulf %78, %82 : vector<2x32xf32>
    %84 = vector.extract_strided_slice %5 {offsets = [8, 0], sizes = [2, 128], strides = [1, 1]} : vector<16x128xf32> to vector<2x128xf32>
    %c0_23 = arith.constant 0 : index
    %c0_24 = arith.constant 0 : index
    %85 = vector.load %arg2[%c0_23, %c0_24] : memref<32x128xf32, #tpu.memory_space<vmem>>, vector<32x128xf32>
    %cst_25 = arith.constant dense<0.000000e+00> : vector<2x128xf32>
    %86 = tpu.matmul %83, %85, %cst_25 {dimension_numbers = #tpu.dot_dimension_numbers<[1], [0], [0], [1], [0, 0, 1, 1], [], []>} : vector<2x32xf32>, vector<32x128xf32>, vector<2x128xf32> -> vector<2x128xf32>
    %87 = arith.addf %84, %86 : vector<2x128xf32>
    %88 = arith.negf %87 : vector<2x128xf32>
    %89 = math.exp %88 : vector<2x128xf32>
    %cst_26 = arith.constant 1.000000e+00 : f32
    %90 = vector.broadcast %cst_26 : f32 to vector<2x128xf32>
    %91 = arith.addf %90, %89 : vector<2x128xf32>
    %92 = arith.divf %90, %91 : vector<2x128xf32>
    %93 = math.tanh %87 : vector<2x128xf32>
    %94 = vector.extract_strided_slice %92 {offsets = [0, 0], sizes = [2, 32], strides = [1, 1]} : vector<2x128xf32> to vector<2x32xf32>
    %95 = vector.extract_strided_slice %92 {offsets = [0, 32], sizes = [2, 32], strides = [1, 1]} : vector<2x128xf32> to vector<2x32xf32>
    %96 = vector.extract_strided_slice %93 {offsets = [0, 64], sizes = [2, 32], strides = [1, 1]} : vector<2x128xf32> to vector<2x32xf32>
    %97 = vector.extract_strided_slice %92 {offsets = [0, 96], sizes = [2, 32], strides = [1, 1]} : vector<2x128xf32> to vector<2x32xf32>
    %98 = arith.mulf %95, %81 : vector<2x32xf32>
    %99 = arith.mulf %94, %96 : vector<2x32xf32>
    %100 = arith.addf %98, %99 : vector<2x32xf32>
    %101 = math.tanh %100 : vector<2x32xf32>
    %102 = arith.mulf %97, %101 : vector<2x32xf32>
    %103 = vector.extract_strided_slice %5 {offsets = [10, 0], sizes = [2, 128], strides = [1, 1]} : vector<16x128xf32> to vector<2x128xf32>
    %c0_27 = arith.constant 0 : index
    %c0_28 = arith.constant 0 : index
    %104 = vector.load %arg2[%c0_27, %c0_28] : memref<32x128xf32, #tpu.memory_space<vmem>>, vector<32x128xf32>
    %cst_29 = arith.constant dense<0.000000e+00> : vector<2x128xf32>
    %105 = tpu.matmul %102, %104, %cst_29 {dimension_numbers = #tpu.dot_dimension_numbers<[1], [0], [0], [1], [0, 0, 1, 1], [], []>} : vector<2x32xf32>, vector<32x128xf32>, vector<2x128xf32> -> vector<2x128xf32>
    %106 = arith.addf %103, %105 : vector<2x128xf32>
    %107 = arith.negf %106 : vector<2x128xf32>
    %108 = math.exp %107 : vector<2x128xf32>
    %cst_30 = arith.constant 1.000000e+00 : f32
    %109 = vector.broadcast %cst_30 : f32 to vector<2x128xf32>
    %110 = arith.addf %109, %108 : vector<2x128xf32>
    %111 = arith.divf %109, %110 : vector<2x128xf32>
    %112 = math.tanh %106 : vector<2x128xf32>
    %113 = vector.extract_strided_slice %111 {offsets = [0, 0], sizes = [2, 32], strides = [1, 1]} : vector<2x128xf32> to vector<2x32xf32>
    %114 = vector.extract_strided_slice %111 {offsets = [0, 32], sizes = [2, 32], strides = [1, 1]} : vector<2x128xf32> to vector<2x32xf32>
    %115 = vector.extract_strided_slice %112 {offsets = [0, 64], sizes = [2, 32], strides = [1, 1]} : vector<2x128xf32> to vector<2x32xf32>
    %116 = vector.extract_strided_slice %111 {offsets = [0, 96], sizes = [2, 32], strides = [1, 1]} : vector<2x128xf32> to vector<2x32xf32>
    %117 = arith.mulf %114, %100 : vector<2x32xf32>
    %118 = arith.mulf %113, %115 : vector<2x32xf32>
    %119 = arith.addf %117, %118 : vector<2x32xf32>
    %120 = math.tanh %119 : vector<2x32xf32>
    %121 = arith.mulf %116, %120 : vector<2x32xf32>
    %122 = vector.extract_strided_slice %5 {offsets = [12, 0], sizes = [2, 128], strides = [1, 1]} : vector<16x128xf32> to vector<2x128xf32>
    %c0_31 = arith.constant 0 : index
    %c0_32 = arith.constant 0 : index
    %123 = vector.load %arg2[%c0_31, %c0_32] : memref<32x128xf32, #tpu.memory_space<vmem>>, vector<32x128xf32>
    %cst_33 = arith.constant dense<0.000000e+00> : vector<2x128xf32>
    %124 = tpu.matmul %121, %123, %cst_33 {dimension_numbers = #tpu.dot_dimension_numbers<[1], [0], [0], [1], [0, 0, 1, 1], [], []>} : vector<2x32xf32>, vector<32x128xf32>, vector<2x128xf32> -> vector<2x128xf32>
    %125 = arith.addf %122, %124 : vector<2x128xf32>
    %126 = arith.negf %125 : vector<2x128xf32>
    %127 = math.exp %126 : vector<2x128xf32>
    %cst_34 = arith.constant 1.000000e+00 : f32
    %128 = vector.broadcast %cst_34 : f32 to vector<2x128xf32>
    %129 = arith.addf %128, %127 : vector<2x128xf32>
    %130 = arith.divf %128, %129 : vector<2x128xf32>
    %131 = math.tanh %125 : vector<2x128xf32>
    %132 = vector.extract_strided_slice %130 {offsets = [0, 0], sizes = [2, 32], strides = [1, 1]} : vector<2x128xf32> to vector<2x32xf32>
    %133 = vector.extract_strided_slice %130 {offsets = [0, 32], sizes = [2, 32], strides = [1, 1]} : vector<2x128xf32> to vector<2x32xf32>
    %134 = vector.extract_strided_slice %131 {offsets = [0, 64], sizes = [2, 32], strides = [1, 1]} : vector<2x128xf32> to vector<2x32xf32>
    %135 = vector.extract_strided_slice %130 {offsets = [0, 96], sizes = [2, 32], strides = [1, 1]} : vector<2x128xf32> to vector<2x32xf32>
    %136 = arith.mulf %133, %119 : vector<2x32xf32>
    %137 = arith.mulf %132, %134 : vector<2x32xf32>
    %138 = arith.addf %136, %137 : vector<2x32xf32>
    %139 = math.tanh %138 : vector<2x32xf32>
    %140 = arith.mulf %135, %139 : vector<2x32xf32>
    %141 = vector.extract_strided_slice %5 {offsets = [14, 0], sizes = [2, 128], strides = [1, 1]} : vector<16x128xf32> to vector<2x128xf32>
    %c0_35 = arith.constant 0 : index
    %c0_36 = arith.constant 0 : index
    %142 = vector.load %arg2[%c0_35, %c0_36] : memref<32x128xf32, #tpu.memory_space<vmem>>, vector<32x128xf32>
    %cst_37 = arith.constant dense<0.000000e+00> : vector<2x128xf32>
    %143 = tpu.matmul %140, %142, %cst_37 {dimension_numbers = #tpu.dot_dimension_numbers<[1], [0], [0], [1], [0, 0, 1, 1], [], []>} : vector<2x32xf32>, vector<32x128xf32>, vector<2x128xf32> -> vector<2x128xf32>
    %144 = arith.addf %141, %143 : vector<2x128xf32>
    %145 = arith.negf %144 : vector<2x128xf32>
    %146 = math.exp %145 : vector<2x128xf32>
    %cst_38 = arith.constant 1.000000e+00 : f32
    %147 = vector.broadcast %cst_38 : f32 to vector<2x128xf32>
    %148 = arith.addf %147, %146 : vector<2x128xf32>
    %149 = arith.divf %147, %148 : vector<2x128xf32>
    %150 = math.tanh %144 : vector<2x128xf32>
    %151 = vector.extract_strided_slice %149 {offsets = [0, 0], sizes = [2, 32], strides = [1, 1]} : vector<2x128xf32> to vector<2x32xf32>
    %152 = vector.extract_strided_slice %149 {offsets = [0, 32], sizes = [2, 32], strides = [1, 1]} : vector<2x128xf32> to vector<2x32xf32>
    %153 = vector.extract_strided_slice %150 {offsets = [0, 64], sizes = [2, 32], strides = [1, 1]} : vector<2x128xf32> to vector<2x32xf32>
    %154 = vector.extract_strided_slice %149 {offsets = [0, 96], sizes = [2, 32], strides = [1, 1]} : vector<2x128xf32> to vector<2x32xf32>
    %155 = arith.mulf %152, %138 : vector<2x32xf32>
    %156 = arith.mulf %151, %153 : vector<2x32xf32>
    %157 = arith.addf %155, %156 : vector<2x32xf32>
    %158 = math.tanh %157 : vector<2x32xf32>
    %159 = arith.mulf %154, %158 : vector<2x32xf32>
    %c0_39 = arith.constant 0 : index
    %c0_40 = arith.constant 0 : index
    %160 = vector.load %arg5[%c0_39, %c0_40] : memref<32x9xf32, #tpu.memory_space<vmem>>, vector<32x9xf32>
    %c0_41 = arith.constant 0 : index
    %c0_42 = arith.constant 0 : index
    %161 = vector.load %arg4[%c0_41, %c0_42] : memref<9x512xf32, #tpu.memory_space<vmem>>, vector<9x512xf32>
    %cst_43 = arith.constant dense<0.000000e+00> : vector<32x512xf32>
    %162 = tpu.matmul %160, %161, %cst_43 {dimension_numbers = #tpu.dot_dimension_numbers<[1], [0], [0], [1], [0, 0, 1, 1], [], []>} : vector<32x9xf32>, vector<9x512xf32>, vector<32x512xf32> -> vector<32x512xf32>
    %c0_44 = arith.constant 0 : index
    %c0_45 = arith.constant 0 : index
    %163 = vector.load %arg6[%c0_44, %c0_45] : memref<32x1xf32, #tpu.memory_space<vmem>>, vector<32x1xf32>
    %164 = vector.broadcast %163 : vector<32x1xf32> to vector<32x512xf32>
    %165 = arith.addf %162, %164 : vector<32x512xf32>
    %cst_46 = arith.constant 0.000000e+00 : f32
    %166 = vector.broadcast %cst_46 : f32 to vector<32x512xf32>
    %167 = arith.maximumf %165, %166 : vector<32x512xf32>
    %c0_47 = arith.constant 0 : index
    %c0_48 = arith.constant 0 : index
    %168 = vector.load %arg7[%c0_47, %c0_48] : memref<2x512xf32, #tpu.memory_space<vmem>>, vector<2x512xf32>
    %cst_49 = arith.constant dense<0.000000e+00> : vector<2x32xf32>
    %169 = tpu.matmul %168, %167, %cst_49 {dimension_numbers = #tpu.dot_dimension_numbers<[1], [1], [0], [0], [0, 0, 1, 0], [], []>} : vector<2x512xf32>, vector<32x512xf32>, vector<2x32xf32> -> vector<2x32xf32>
    %c0_50 = arith.constant 0 : index
    %c0_51 = arith.constant 0 : index
    %170 = vector.load %arg8[%c0_50, %c0_51] : memref<32x32xf32, #tpu.memory_space<vmem>>, vector<32x32xf32>
    %cst_52 = arith.constant dense<0.000000e+00> : vector<2x32xf32>
    %171 = tpu.matmul %159, %170, %cst_52 {dimension_numbers = #tpu.dot_dimension_numbers<[1], [0], [0], [1], [0, 0, 1, 1], [], []>} : vector<2x32xf32>, vector<32x32xf32>, vector<2x32xf32> -> vector<2x32xf32>
    %c0_53 = arith.constant 0 : index
    %c0_54 = arith.constant 0 : index
    %172 = vector.load %arg9[%c0_53, %c0_54] : memref<32x32xf32, #tpu.memory_space<vmem>>, vector<32x32xf32>
    %cst_55 = arith.constant dense<0.000000e+00> : vector<2x32xf32>
    %173 = tpu.matmul %169, %172, %cst_55 {dimension_numbers = #tpu.dot_dimension_numbers<[1], [0], [0], [1], [0, 0, 1, 1], [], []>} : vector<2x32xf32>, vector<32x32xf32>, vector<2x32xf32> -> vector<2x32xf32>
    %174 = arith.addf %171, %173 : vector<2x32xf32>
    %c0_56 = arith.constant 0 : index
    %c0_57 = arith.constant 0 : index
    %175 = vector.load %arg10[%c0_56, %c0_57] : memref<1x32xf32, #tpu.memory_space<vmem>>, vector<1x32xf32>
    %176 = vector.broadcast %175 : vector<1x32xf32> to vector<2x32xf32>
    %177 = arith.addf %174, %176 : vector<2x32xf32>
    %c0_58 = arith.constant 0 : index
    %c0_59 = arith.constant 0 : index
    %178 = vector.load %arg11[%c0_58, %c0_59] : memref<2x32xf32, #tpu.memory_space<vmem>>, vector<2x32xf32>
    tpu.vector_store %arg11[%c0_58, %c0_59], %177 {strides = array<i32>} : memref<2x32xf32, #tpu.memory_space<vmem>>, vector<2x32xf32>,
    return
  }
}

</mosaic_0001>

<bundles_post_ra>
// kernel: encoder_forward.1
= control target key start
LH: loop header
LB: loop body
LE: loop exit
PB: predicated region body
PF: predicated region fallthrough
CT: control target
= control target key end

     0   :  { %vm50_vm0 = vcmask 130048   ;;  %v1977_v3 = vmov 0.0|0.0   ;;  %vm1978_vm1 = vmmov 0   ;;  %v1979_v10 = vmov 0.0   ;;  %s2320_s0 = inlined_call_operand.vmem [shape: f32[16,16], index: 0, kind: input, shape index: {}]   ;;  %s2321_s1 = inlined_call_operand.vmem [shape: f32[16,128], index: 1, kind: input, shape index: {}]   ;;  %s2322_s2 = inlined_call_operand.vmem [shape: f32[32,128], index: 2, kind: input, shape index: {}]   ;;  %s2323_s3 = inlined_call_operand.vmem [shape: f32[1,128], index: 3, kind: input, shape index: {}]   ;;  %s2324_s4 = inlined_call_operand.vmem [shape: f32[9,512], index: 4, kind: input, shape index: {}]   ;;  %s2325_s5 = inlined_call_operand.vmem [shape: f32[32,9], index: 5, kind: input, shape index: {}]   ;;  %s2326_s6 = inlined_call_operand.vmem [shape: f32[32,1], index: 6, kind: input, shape index: {}]   ;;  %s2327_s7 = inlined_call_operand.vmem [shape: f32[2,512], index: 7, kind: input, shape index: {}]   ;;  %s2328_s8 = inlined_call_operand.vmem [shape: f32[32,32], index: 8, kind: input, shape index: {}]   ;;  %s2329_s9 = inlined_call_operand.vmem [shape: f32[32,32], index: 9, kind: input, shape index: {}]   ;;  %s2330_s10 = inlined_call_operand.vmem [shape: f32[1,32], index: 10, kind: input, shape index: {}]   ;;  %s2331_s11 = inlined_call_operand.hbm [shape: f32[2,32], index: 11, kind: output, shape index: {}]  }
   0x1   :  { %v41_v0 = vld [vmem:[%s2321_s1] sm:$0xff]  ;;  %v42_v1 = vld [vmem:[%s2321_s1 + $0x8] sm:$0xff]  ;;  %1787 = vmatprep.subr.bf16.mxu1 %v1977_v3  ;;  %v134_v8 = vld [vmem:[%s2322_s2 + $0x10] sm:$0xff]  ;;  %1681 = vmatprep.mubr.msk.f32.mxu1 %vm1978_vm1, %v1979_v10 }
   0x2   :  { %v132_v2 = vld [vmem:[%s2322_s2] sm:$0xff]  ;;  %v1783_v4 = vpack.c.bf16 %v42_v1, %v41_v0  ;;  %v133_v5 = vld [vmem:[%s2322_s2 + $0x8] sm:$0xff]  ;;  %v135_v9 = vld [vmem:[%s2322_s2 + $0x18] sm:$0xff] }
   0x3   :  { %v39_v6 = vld [vmem:[%s2320_s0] sm:$0xff]  ;;  %v2062_v7 = vpack.c.bf16 %v133_v5, %v132_v2 }
   0x4   :  { %1670 = vmatprep.mubr.msk.f32.mxu0 %vm50_vm0, %v39_v6 }
   0x5   :  { %16 = vsyncpa [#allocation3], 0  ;;  %1784 = vmatprep.subr.bf16.mxu0 %v1783_v4  ;;  %1789 = vmatpush3.bf16.msra.mxu1 %v2062_v7  ;;  %v40_v11 = vld [vmem:[%s2320_s0 + $0x8] sm:$0xff]  ;;  %v2077_v12 = vpack.c.bf16 %v135_v9, %v134_v8  ;;  %v1579_v13 = vld [vmem:[%s2323_s3] ss:$0 sm:$0xff]  ;;  %s1980_s13 = smov 64  }
   0x6   :  { %1786 = vmatpush3.bf16.msra.mxu0 %v1783_v4  ;;  %1790 = vmatprep.subr.bf16.mxu1 %v1977_v3  ;;  %s1981_s3 = smov 32   ;;  %vm136_vm2 = vcmask 261120   ;;  %vm1028_vm3 = vcmask 1040384   ;;  %vm1982_vm4 = vmmov 1   ;;  %vm1015_vm6 = vcmask 72704   ;;  %s1985_s17 = smov [#allocation2]  }
   0x7   :  { %1793 = vmatprep.subr.bf16.mxu0 %v1977_v3  ;;  %vm2185_vm5 = vmpackc.low %vm1028_vm3, %vm1982_vm4  ;;  %s1571_s18 = sshll.u32 %s1985_s17, 4  ;;  %vm1563_vm7 = vcmask 254976   ;;  %s1572_s18 = int_to_ptr.vmem [resolvable:$true] %s1571_s18 }
   0x8   :  { %p1958_p1 = scmp.lt.s32.totalorder %s1572_s18, %s1572_s18 }
   0x9   :  { %1671 = vmatmul.mubr.msk.f32.vlgmr.msra.gmra.mrb[0].mxu0 %vm50_vm0, %v40_v11  ;;  %1792 = vmatpush3.bf16.msra.mxu1 %v2077_v12 }
   0xa   :  { %1795 = vmatpush3.bf16.msra.mxu0 %v2062_v7  ;;  %1692 = vmatprep.mubr.msk.f32.mxu0 %vm1978_vm1, %v1979_v10 }
   0xb   :  { %1796 = vmatprep.subr.bf16.mxu0 %v1977_v3  ;;  %1799 = vmatprep.subr.bf16.mxu1 %v1977_v3 }
   0xc   :  { %1682 = vmatmul.mubr.f32.vlgmr.msra.gmra.mrb[0].mxu1 %v1979_v10 }
   0xd   :  { %1801 = vmatpush3.bf16.msra.mxu1 %v2062_v7  ;;  %1703 = vmatprep.mubr.msk.f32.mxu1 %vm1978_vm1, %v1979_v10 }
   0xe   :  { %1798 = vmatpush3.bf16.msra.mxu0 %v2077_v12  ;;  %1802 = vmatprep.subr.bf16.mxu1 %v1977_v3 }
   0xf   :  { %1805 = vmatprep.subr.bf16.mxu0 %v1977_v3 }
  0x11   :  { %1804 = vmatpush3.bf16.msra.mxu1 %v2077_v12 }
  0x12   :  { %1811 = vmatprep.subr.bf16.mxu1 %v1977_v3 }
  0xdc   :  { %v1672_v14 = vpop.f32.mrb[0].mxu0 }
  0xdd   :  { %v2100_v15 = vadd.f32 %v1672_v14, %v1579_v13  ;;  %v123_v16 = vpop.f32.mrb[1].mxu0 }
  0xde   :  { %v2102_v17 = vadd.f32 %v1579_v13, %v123_v16 }
  0xdf   :  { %v206_v18 = vpop.f32.mrb[0].mxu1 }
  0xe0   :  { %v210_v19 = vadd.f32 %v206_v18, %v2102_v17  ;;  %v1683_v20 = vpop.f32.mrb[1].mxu1 }
  0xe2   :  { %1889 = vtanh.f32 %v210_v19  ;;  %v1582_v22 = vmul.f32 -1.442695, %v210_v19 }
  0xe4   :  { %1891 = vpow2.f32 %v1582_v22 }
  0xec   :  { %v1890_v21 = vpop.eup %1889 }
  0xed   :  { %220 = vrot.lane.b32.xlu0 %v1890_v21, %s1980_s13 }
  0xee   :  { %v1892_v23 = vpop.eup %1891 }
  0xef   :  { %v214_v24 = vadd.f32 1.0, %v1892_v23 }
  0xf1   :  { %1893 = vrcp.f32 %v214_v24 }
  0xfb   :  { %v1894_v25 = vpop.eup %1893 }
  0xfc   :  { %v218_v28 = vmul.f32 0.0, %v1894_v25 }
 0x15f   :  { %v221_v26 = vpop.permute.xlu0 %220 }
 0x160   :  { %v223_v27 = vmul.f32 %v1894_v25, %v221_v26 }
 0x162   :  { %225 = vrot.lane.b32.xlu0 %v223_v27, %s1981_s3 }
 0x1d4   :  { %v226_v29 = vpop.permute.xlu0 %225 }
 0x1d5   :  { %v228_v30 = vadd.f32 %v226_v29, %v218_v28 }
 0x1d7   :  { %1895 = vtanh.f32 %v228_v30  ;;  %v322_v46 = vrot.slane %v228_v30, 6 }
 0x1e1   :  { %v1896_v31 = vpop.eup %1895 }
 0x1e2   :  { %231 = vrot.lane.b32.xlu1 %v1896_v31, %s1980_s13 }
 0x254   :  { %v232_v32 = vpop.permute.xlu1 %231 }
 0x255   :  { %v234_v33 = vmul.f32 %v1894_v25, %v232_v32 }
 0x257   :  { %236 = vrot.lane.b32.xlu1 %v234_v33, %s1981_s3 }
 0x2c9   :  { %v237_v34 = vpop.permute.xlu1 %236 }
 0x2ca   :  { %1693 = vmatmul.mubr.msk.f32.vlgmr.msra.gmra.mrb[2].mxu0 %vm136_vm2, %v237_v34 }
 0x2cb   :  { %1807 = vmatpush3.bf16.msra.mxu0 %v2062_v7  ;;  %1714 = vmatprep.mubr.msk.f32.mxu0 %vm1978_vm1, %v1979_v10 }
 0x2cc   :  { %1808 = vmatprep.subr.bf16.mxu0 %v1977_v3 }
 0x2cf   :  { %1810 = vmatpush3.bf16.msra.mxu0 %v2077_v12 }
 0x2d0   :  { %1817 = vmatprep.subr.bf16.mxu0 %v1977_v3 }
 0x39d   :  { %v306_v35 = vpop.f32.mrb[2].mxu0 }
 0x39e   :  { %v311_v36 = vrot.slane %v306_v35, 6  ;;  %v1694_v37 = vpop.f32.mrb[3].mxu0 }
 0x3a0   :  { %v313_v38 = vadd.f32 %v311_v36, %v2102_v17 }
 0x3a2   :  { %1897 = vtanh.f32 %v313_v38  ;;  %v1584_v40 = vmul.f32 -1.442695, %v313_v38 }
 0x3a4   :  { %1899 = vpow2.f32 %v1584_v40 }
 0x3ac   :  { %v1898_v39 = vpop.eup %1897 }
 0x3ad   :  { %326 = vrot.lane.b32.xlu0 %v1898_v39, %s1980_s13 }
 0x3ae   :  { %v1900_v41 = vpop.eup %1899 }
 0x3af   :  { %v317_v42 = vadd.f32 1.0, %v1900_v41 }
 0x3b1   :  { %1901 = vrcp.f32 %v317_v42 }
 0x3bb   :  { %v1902_v43 = vpop.eup %1901 }
 0x3bc   :  { %v324_v47 = vmul.f32 %v1902_v43, %v322_v46 }
 0x41f   :  { %v327_v44 = vpop.permute.xlu0 %326 }
 0x420   :  { %v329_v45 = vmul.f32 %v1902_v43, %v327_v44 }
 0x422   :  { %331 = vrot.lane.b32.xlu1 %v329_v45, %s1981_s3 }
 0x494   :  { %v332_v48 = vpop.permute.xlu1 %331 }
 0x495   :  { %v334_v49 = vadd.f32 %v332_v48, %v324_v47 }
 0x497   :  { %1903 = vtanh.f32 %v334_v49  ;;  %v429_v2 = vrot.slane %v334_v49, 6 }
 0x4a1   :  { %v1904_v50 = vpop.eup %1903 }
 0x4a2   :  { %337 = vrot.lane.b32.xlu0 %v1904_v50, %s1980_s13 }
 0x514   :  { %v338_v51 = vpop.permute.xlu0 %337 }
 0x515   :  { %v340_v52 = vmul.f32 %v1902_v43, %v338_v51 }
 0x517   :  { %v342_v53 = vrot.slane %v340_v52, 2 }
 0x519   :  { %343 = vrot.lane.b32.xlu1 %v342_v53, %s1981_s3 }
 0x58b   :  { %v344_v54 = vpop.permute.xlu1 %343 }
 0x58c   :  { %1704 = vmatmul.mubr.msk.f32.vlgmr.msra.gmra.mrb[2].mxu1 %vm136_vm2, %v344_v54 }
 0x58d   :  { %1813 = vmatpush3.bf16.msra.mxu1 %v2062_v7  ;;  %1725 = vmatprep.mubr.msk.f32.mxu1 %vm1978_vm1, %v1979_v10 }
 0x58e   :  { %1814 = vmatprep.subr.bf16.mxu1 %v1977_v3 }
 0x591   :  { %1816 = vmatpush3.bf16.msra.mxu1 %v2077_v12 }
 0x592   :  { %1823 = vmatprep.subr.bf16.mxu1 %v1977_v3 }
 0x65f   :  { %v413_v55 = vpop.f32.mrb[2].mxu1 }
 0x660   :  { %v418_v56 = vrot.slane %v413_v55, 4  ;;  %v1705_v57 = vpop.f32.mrb[3].mxu1 }
 0x662   :  { %v420_v58 = vadd.f32 %v418_v56, %v2102_v17 }
 0x664   :  { %1905 = vtanh.f32 %v420_v58  ;;  %v1586_v60 = vmul.f32 -1.442695, %v420_v58 }
 0x666   :  { %1907 = vpow2.f32 %v1586_v60 }
 0x66e   :  { %v1906_v59 = vpop.eup %1905 }
 0x66f   :  { %433 = vrot.lane.b32.xlu0 %v1906_v59, %s1980_s13 }
 0x670   :  { %v1908_v61 = vpop.eup %1907 }
 0x671   :  { %v424_v62 = vadd.f32 1.0, %v1908_v61 }
 0x673   :  { %1909 = vrcp.f32 %v424_v62 }
 0x67d   :  { %v1910_v63 = vpop.eup %1909 }
 0x67e   :  { %v431_v4 = vmul.f32 %v1910_v63, %v429_v2 }
 0x6e1   :  { %v434_v0 = vpop.permute.xlu0 %433 }
 0x6e2   :  { %v436_v1 = vmul.f32 %v1910_v63, %v434_v0 }
 0x6e4   :  { %438 = vrot.lane.b32.xlu1 %v436_v1, %s1981_s3 }
 0x756   :  { %v439_v5 = vpop.permute.xlu1 %438 }
 0x757   :  { %v441_v6 = vadd.f32 %v439_v5, %v431_v4 }
 0x759   :  { %1911 = vtanh.f32 %v441_v6  ;;  %v536_v28 = vrot.slane %v441_v6, 6 }
 0x763   :  { %v1912_v8 = vpop.eup %1911 }
 0x764   :  { %444 = vrot.lane.b32.xlu0 %v1912_v8, %s1980_s13 }
 0x7d6   :  { %v445_v9 = vpop.permute.xlu0 %444 }
 0x7d7   :  { %v447_v11 = vmul.f32 %v1910_v63, %v445_v9 }
 0x7d9   :  { %v449_v13 = vrot.slane %v447_v11, 4 }
 0x7db   :  { %450 = vrot.lane.b32.xlu1 %v449_v13, %s1981_s3 }
 0x84d   :  { %v451_v14 = vpop.permute.xlu1 %450 }
 0x84e   :  { %1715 = vmatmul.mubr.msk.f32.vlgmr.msra.gmra.mrb[4].mxu0 %vm136_vm2, %v451_v14 }
 0x84f   :  { %1819 = vmatpush3.bf16.msra.mxu0 %v2062_v7  ;;  %1736 = vmatprep.mubr.msk.f32.mxu0 %vm1978_vm1, %v1979_v10 }
 0x850   :  { %1820 = vmatprep.subr.bf16.mxu0 %v1977_v3 }
 0x853   :  { %1822 = vmatpush3.bf16.msra.mxu0 %v2077_v12 }
 0x854   :  { %1829 = vmatprep.subr.bf16.mxu0 %v1977_v3 }
 0x921   :  { %v520_v16 = vpop.f32.mrb[4].mxu0 }
 0x922   :  { %v525_v18 = vrot.slane %v520_v16, 2  ;;  %v1716_v19 = vpop.f32.mrb[5].mxu0 }
 0x924   :  { %v527_v20 = vadd.f32 %v525_v18, %v2102_v17 }
 0x926   :  { %1913 = vtanh.f32 %v527_v20  ;;  %v1588_v22 = vmul.f32 -1.442695, %v527_v20 }
 0x928   :  { %1915 = vpow2.f32 %v1588_v22 }
 0x930   :  { %v1914_v21 = vpop.eup %1913 }
 0x931   :  { %540 = vrot.lane.b32.xlu0 %v1914_v21, %s1980_s13 }
 0x932   :  { %v1916_v23 = vpop.eup %1915 }
 0x933   :  { %v531_v24 = vadd.f32 1.0, %v1916_v23 }
 0x935   :  { %1917 = vrcp.f32 %v531_v24 }
 0x93f   :  { %v1918_v25 = vpop.eup %1917 }
 0x940   :  { %v538_v29 = vmul.f32 %v1918_v25, %v536_v28 }
 0x9a3   :  { %v541_v26 = vpop.permute.xlu0 %540 }
 0x9a4   :  { %v543_v27 = vmul.f32 %v1918_v25, %v541_v26 }
 0x9a6   :  { %545 = vrot.lane.b32.xlu1 %v543_v27, %s1981_s3 }
 0xa18   :  { %v546_v30 = vpop.permute.xlu1 %545 }
 0xa19   :  { %v548_v31 = vadd.f32 %v546_v30, %v538_v29  ;;  %v984_v30 = vld [vmem:[%s2324_s4 + $0x8] sm:$0xff] }
 0xa1b   :  { %1919 = vtanh.f32 %v548_v31  ;;  %v640_v46 = vrot.slane %v548_v31, 6  ;;  %v988_v31 = vld [vmem:[%s2324_s4 + $0x28] sm:$0x1] }
 0xa25   :  { %v1920_v17 = vpop.eup %1919 }
 0xa26   :  { %551 = vrot.lane.b32.xlu0 %v1920_v17, %s1980_s13  ;;  %v983_v17 = vld [vmem:[%s2324_s4] sm:$0xff] }
 0xa98   :  { %v552_v32 = vpop.permute.xlu0 %551 }
 0xa99   :  { %v554_v33 = vmul.f32 %v1918_v25, %v552_v32  ;;  %v1835_v32 = vpack.c.bf16 %v988_v31, %v984_v30 }
 0xa9b   :  { %v556_v34 = vrot.slane %v554_v33, 6 }
 0xa9d   :  { %557 = vrot.lane.b32.xlu1 %v556_v34, %s1981_s3  ;;  %v987_v34 = vld [vmem:[%s2324_s4 + $0x20] sm:$0x1] }
 0xb0f   :  { %v558_v35 = vpop.permute.xlu1 %557 }
 0xb10   :  { %1726 = vmatmul.mubr.msk.f32.vlgmr.msra.gmra.mrb[4].mxu1 %vm136_vm2, %v558_v35  ;;  %v1838_v35 = vpack.c.bf16 %v987_v34, %v983_v17 }
 0xb11   :  { %1825 = vmatpush3.bf16.msra.mxu1 %v2062_v7  ;;  %1747 = vmatprep.mubr.msk.f32.mxu1 %vm1978_vm1, %v1979_v10 }
 0xb12   :  { %1826 = vmatprep.subr.bf16.mxu1 %v1977_v3 }
 0xb15   :  { %1828 = vmatpush3.bf16.msra.mxu1 %v2077_v12 }
 0xb16   :  { %1837 = vmatprep.subr.msk.bf16.mxu1 %vm2185_vm5, %v1835_v32 }
 0xbe3   :  { %v627_v36 = vpop.f32.mrb[4].mxu1 }
 0xbe4   :  { %v631_v37 = vadd.f32 %v627_v36, %v2100_v15  ;;  %v1727_v38 = vpop.f32.mrb[5].mxu1  ;;  %v986_v36 = vld [vmem:[%s2324_s4 + $0x18] sm:$0xff] }
 0xbe5   :  { %v979_v38 = vld [vmem:[%s2325_s5] sm:$0xff] }
 0xbe6   :  { %1921 = vtanh.f32 %v631_v37  ;;  %v1590_v40 = vmul.f32 -1.442695, %v631_v37  ;;  %v990_v37 = vld [vmem:[%s2324_s4 + $0x38] sm:$0x1] }
 0xbe8   :  { %1923 = vpow2.f32 %v1590_v40 }
 0xbf0   :  { %v1922_v39 = vpop.eup %1921 }
 0xbf1   :  { %644 = vrot.lane.b32.xlu0 %v1922_v39, %s1980_s13  ;;  %v1841_v39 = vpack.c.bf16 %v990_v37, %v986_v36 }
 0xbf2   :  { %v1924_v41 = vpop.eup %1923 }
 0xbf3   :  { %v635_v42 = vadd.f32 1.0, %v1924_v41  ;;  %v980_v41 = vld [vmem:[%s2325_s5 + $0x8] sm:$0xff] }
 0xbf5   :  { %1925 = vrcp.f32 %v635_v42 }
 0xbff   :  { %v1926_v43 = vpop.eup %1925 }
 0xc00   :  { %v642_v47 = vmul.f32 %v1926_v43, %v640_v46  ;;  %v991_v46 = vld [vmem:[%s2326_s6] sm:$0xff] }
 0xc63   :  { %v645_v44 = vpop.permute.xlu0 %644 }
 0xc64   :  { %v647_v45 = vmul.f32 %v1926_v43, %v645_v44  ;;  %v981_v44 = vld [vmem:[%s2325_s5 + $0x10] sm:$0xff] }
 0xc66   :  { %649 = vrot.lane.b32.xlu1 %v647_v45, %s1981_s3  ;;  %v982_v45 = vld [vmem:[%s2325_s5 + $0x18] sm:$0xff]  ;;  %s1953_s5 = scalar_lea.vmem %s1572_s18, 32 }
 0xc67   :  { %p1954_p0 = scmp.ne.s32.totalorder %s1572_s18, %s1953_s5  ;;  %p1959_p2 = scmp.lt.s32.totalorder %s1953_s5, %s1953_s5 }
 0xc69   :  { %p1960_p3 = por %p1959_p2, %p1958_p1 }
 0xc6b   :  { %p1961_p4 = pnand %p1960_p3, %p1954_p0 }
 0xcd8   :  { %v650_v48 = vpop.permute.xlu1 %649 }
 0xcd9   :  { %v652_v49 = vadd.f32 %v650_v48, %v642_v47  ;;  %v992_v47 = vld [vmem:[%s2326_s6 + $0x8] sm:$0xff]  ;;  %v1983_v48 = vmov 0  }
 0xcda   :  { %1887 = vset.pattern.permute.xlu1 %v1983_v48  ;;  %1886 = vset.pattern.permute.xlu0 %v1983_v48 }
 0xcdb   :  { %1927 = vtanh.f32 %v652_v49 }
 0xce5   :  { %v1928_v50 = vpop.eup %1927 }
 0xce6   :  { %655 = vrot.lane.b32.xlu0 %v1928_v50, %s1980_s13  ;;  %v993_v50 = vld [vmem:[%s2326_s6 + $0x10] sm:$0xff] }
 0xd58   :  { %v656_v51 = vpop.permute.xlu0 %655 }
 0xd59   :  { %v658_v52 = vmul.f32 %v1926_v43, %v656_v51  ;;  %v985_v51 = vld [vmem:[%s2324_s4 + $0x10] sm:$0xff] }
 0xd5b   :  { %660 = vrot.lane.b32.xlu1 %v658_v52, %s1981_s3  ;;  %v989_v52 = vld [vmem:[%s2324_s4 + $0x30] sm:$0x1] }
 0xdcd   :  { %v661_v53 = vpop.permute.xlu1 %660 }
 0xdce   :  { %1737 = vmatmul.mubr.msk.f32.vlgmr.msra.gmra.mrb[6].mxu0 %vm136_vm2, %v661_v53  ;;  %v1844_v53 = vpack.c.bf16 %v989_v52, %v985_v51 }
 0xdcf   :  { %1831 = vmatpush3.bf16.msra.mxu0 %v2062_v7  ;;  %1758 = vmatprep.mubr.msk.f32.mxu0 %vm1978_vm1, %v1979_v10 }
 0xdd0   :  { %1832 = vmatprep.subr.bf16.mxu0 %v1977_v3 }
 0xdd3   :  { %1834 = vmatpush3.bf16.msra.mxu0 %v2077_v12  ;;  %v746_v12 = vrot.slane %v652_v49, 6  ;;  %v994_v49 = vld [vmem:[%s2326_s6 + $0x18] sm:$0xff] }
 0xdd4   :  { %1843 = vmatprep.subr.msk.bf16.mxu0 %vm2185_vm5, %v1841_v39 }
 0xea1   :  { %v730_v54 = vpop.f32.mrb[6].mxu0 }
 0xea2   :  { %v735_v55 = vrot.slane %v730_v54, 6  ;;  %v1738_v56 = vpop.f32.mrb[7].mxu0 }
 0xea4   :  { %v737_v57 = vadd.f32 %v735_v55, %v2100_v15 }
 0xea6   :  { %1929 = vtanh.f32 %v737_v57  ;;  %v1592_v59 = vmul.f32 -1.442695, %v737_v57 }
 0xea8   :  { %1931 = vpow2.f32 %v1592_v59  ;;  %v1241_v59 = vlaneseq }
 0xeb0   :  { %v1930_v58 = vpop.eup %1929 }
 0xeb1   :  { %750 = vrot.lane.b32.xlu0 %v1930_v58, %s1980_s13 }
 0xeb2   :  { %v1932_v60 = vpop.eup %1931 }
 0xeb3   :  { %v741_v7 = vadd.f32 1.0, %v1932_v60 }
 0xeb5   :  { %1933 = vrcp.f32 %v741_v7 }
 0xebf   :  { %v1934_v61 = vpop.eup %1933 }
 0xec0   :  { %v748_v0 = vmul.f32 %v1934_v61, %v746_v12 }
 0xf23   :  { %v751_v62 = vpop.permute.xlu0 %750 }
 0xf24   :  { %v753_v63 = vmul.f32 %v1934_v61, %v751_v62  ;;  %v1984_v62 = vmov 1983009808  }
 0xf26   :  { %755 = vrot.lane.b32.xlu1 %v753_v63, %s1981_s3  ;;  %v1239_v63 = vunpack.c.l.s4 %v1984_v62 }
 0xf98   :  { %v756_v1 = vpop.permute.xlu1 %755 }
 0xf99   :  { %v758_v2 = vadd.f32 %v756_v1, %v748_v0  ;;  %v1242_v1 = vshrl.u32 %v1241_v59, 7 }
 0xf9b   :  { %1935 = vtanh.f32 %v758_v2  ;;  %v853_v25 = vrot.slane %v758_v2, 6 }
 0xfa5   :  { %v1936_v4 = vpop.eup %1935 }
 0xfa6   :  { %761 = vrot.lane.b32.xlu0 %v1936_v4, %s1980_s13 }
0x1018   :  { %v762_v5 = vpop.permute.xlu0 %761 }
0x1019   :  { %v764_v6 = vmul.f32 %v1934_v61, %v762_v5 }
0x101b   :  { %v766_v8 = vrot.slane %v764_v6, 2 }
0x101d   :  { %767 = vrot.lane.b32.xlu1 %v766_v8, %s1981_s3 }
0x108f   :  { %v768_v9 = vpop.permute.xlu1 %767 }
0x1090   :  { %1748 = vmatmul.mubr.msk.f32.vlgmr.msra.gmra.mrb[6].mxu1 %vm136_vm2, %v768_v9  ;;  %v1240_v9 = vunpack.c.0.s8 %v1239_v63 }
0x1091   :  { %1105 = vmatprep.mubr.f32.mxu1 %v1979_v10  ;;  %1840 = vmatpush1.bf16.msk.msra.mxu1 %vm2185_vm5, %v1838_v35 }
0x1094   :  { %1599 = vmatmul.mubr.msk.f32.vlgmr.msra.gmra.mrb[8].mxu1 %vm1015_vm6, %v979_v38 }
0x1095   :  { %1111 = vmatprep.mubr.f32.mxu1 %v1979_v10 }
0x1098   :  { %1600 = vmatmul.mubr.msk.f32.gmra.mrb[10].mxu1 %vm1015_vm6, %v980_v41 }
0x1099   :  { %1117 = vmatprep.mubr.f32.mxu1 %v1979_v10 }
0x109c   :  { %1601 = vmatmul.mubr.msk.f32.gmra.mrb[12].mxu1 %vm1015_vm6, %v981_v44 }
0x109d   :  { %1123 = vmatprep.mubr.f32.mxu1 %v1979_v10 }
0x10a0   :  { %1602 = vmatmul.mubr.msk.f32.gmra.mrb[14].mxu1 %vm1015_vm6, %v982_v45 }
0x1163   :  { %v837_v11 = vpop.f32.mrb[6].mxu1 }
0x1164   :  { %v842_v13 = vrot.slane %v837_v11, 4  ;;  %v1749_v14 = vpop.f32.mrb[7].mxu1 }
0x1166   :  { %v844_v16 = vadd.f32 %v842_v13, %v2100_v15 }
0x1167   :  { %v1107_v55 = vpop.f32.mrb[8].mxu1 }
0x1168   :  { %1937 = vtanh.f32 %v844_v16  ;;  %v1594_v19 = vmul.f32 -1.442695, %v844_v16  ;;  %v1109_v57 = vpop.f32.mrb[9].mxu1 }
0x116a   :  { %1939 = vpow2.f32 %v1594_v19 }
0x116b   :  { %v1113_v60 = vpop.f32.mrb[10].mxu1 }
0x116c   :  { %v1115_v0 = vpop.f32.mrb[11].mxu1 }
0x116f   :  { %v1119_v6 = vpop.f32.mrb[12].mxu1 }
0x1170   :  { %v1121_v13 = vpop.f32.mrb[13].mxu1 }
0x1172   :  { %v1938_v18 = vpop.eup %1937 }
0x1173   :  { %857 = vrot.lane.b32.xlu0 %v1938_v18, %s1980_s13  ;;  %v2259_v18 = vld [vmem:[%s2327_s7] sm:$0xff] }
0x1174   :  { %v1940_v20 = vpop.eup %1939 }
0x1175   :  { %v848_v21 = vadd.f32 1.0, %v1940_v20  ;;  %v1125_v20 = vpop.f32.mrb[14].mxu1 }
0x1177   :  { %1941 = vrcp.f32 %v848_v21 }
0x1181   :  { %v1942_v22 = vpop.eup %1941 }
0x1182   :  { %v855_v26 = vmul.f32 %v1942_v22, %v853_v25  ;;  %v1127_v25 = vpop.f32.mrb[15].mxu1 }
0x11e5   :  { %v858_v23 = vpop.permute.xlu0 %857 }
0x11e6   :  { %v860_v24 = vmul.f32 %v1942_v22, %v858_v23 }
0x11e8   :  { %862 = vrot.lane.b32.xlu1 %v860_v24, %s1981_s3 }
0x125a   :  { %v863_v27 = vpop.permute.xlu1 %862 }
0x125b   :  { %v2172_v28 = vadd.f32 %v863_v27, %v855_v26 }
0x125d   :  { %1943 = vtanh.f32 %v2172_v28 }
0x1267   :  { %v1944_v29 = vpop.eup %1943 }
0x1268   :  { %868 = vrot.lane.b32.xlu0 %v1944_v29, %s1980_s13 }
0x126c   :  { %997 = vperm.xlu0 %1886, %v991_v46  }
0x1270   :  { %1012 = vperm.xlu0 %1886, %v994_v49  }
0x12da   :  { %v869_v40 = vpop.permute.xlu0 %868 }
0x12db   :  { %v871_v42 = vmul.f32 %v1942_v22, %v869_v40  ;;  %v2261_v22 = vsub.s32 %v1240_v9, %v1242_v1 }
0x12dd   :  { %v873_v43 = vrot.slane %v871_v42, 4  ;;  %v1244_v31 = vrot.slane %v2259_v18, %v2261_v22 }
0x12df   :  { %874 = vrot.lane.b32.xlu1 %v873_v43, %s1981_s3  ;;  %v1252_v33 = vcombine.high %v1244_v31, %v1244_v31 }
0x12e1   :  { %1322 = vmatprep.mubr.f32.mxu1 %v1252_v33 }
0x12e3   :  { %1002 = vperm.xlu1 %1887, %v992_v47  }
0x12e7   :  { %1007 = vperm.xlu1 %1887, %v993_v50  }
0x12eb   :  { %v998_v58 = vpop.permute.xlu0 %997 }
0x12ec   :  { %v1108_v7 = vadd.f32 %v1107_v55, %v998_v58  ;;  %v1110_v61 = vadd.f32 %v1109_v57, %v998_v58 }
0x12ee   :  { %v1219_v2 = vmax.f32 %v1108_v7, 0.0  ;;  %v1220_v5 = vmax.f32 %v1110_v61, 0.0 }
0x12ef   :  { %v1013_v16 = vpop.permute.xlu0 %1012 }
0x12f0   :  { %v1126_v24 = vadd.f32 %v1125_v20, %v1013_v16  ;;  %v1128_v29 = vadd.f32 %v1127_v25, %v1013_v16 }
0x12f2   :  { %v1231_v17 = vmax.f32 %v1126_v24, 0.0  ;;  %v1232_v32 = vmax.f32 %v1128_v29, 0.0  ;;  %v1399_v29 = vld [vmem:[%s2328_s8 + $0x8] sm:$0xff] }
0x1351   :  { %v875_v54 = vpop.permute.xlu1 %874 }
0x1352   :  { %1759 = vmatmul.mubr.msk.f32.vlgmr.msra.gmra.mrb[8].mxu0 %vm136_vm2, %v875_v54 }
0x1353   :  { %1846 = vmatpush1.bf16.msk.msra.mxu0 %vm2185_vm5, %v1844_v53  ;;  %1194 = vmatprep.mubr.f32.mxu0 %v1979_v10 }
0x1354   :  { %1863 = vmatprep.subr.bf16.mxu0 %v1977_v3 }
0x1356   :  { %1605 = vmatmul.mubr.msk.f32.vlgmr.msra.gmra.mrb[10].mxu0 %vm1015_vm6, %v979_v38 }
0x1357   :  { %1200 = vmatprep.mubr.f32.mxu0 %v1979_v10 }
0x135a   :  { %1606 = vmatmul.mubr.msk.f32.gmra.mrb[12].mxu0 %vm1015_vm6, %v980_v41 }
0x135b   :  { %1206 = vmatprep.mubr.f32.mxu0 %v1979_v10 }
0x135e   :  { %1607 = vmatmul.mubr.msk.f32.gmra.mrb[14].mxu0 %vm1015_vm6, %v981_v44 }
0x135f   :  { %1212 = vmatprep.mubr.f32.mxu0 %v1979_v10 }
0x1362   :  { %1608 = vmatmul.mubr.msk.f32.gmra.mrb[16].mxu0 %vm1015_vm6, %v982_v45  ;;  %v1003_v56 = vpop.permute.xlu1 %1002 }
0x1363   :  { %1769 = vmatprep.mubr.msk.f32.mxu0 %vm1978_vm1, %v1979_v10  ;;  %v1114_v12 = vadd.f32 %v1113_v60, %v1003_v56  ;;  %v1116_v4 = vadd.f32 %v1115_v0, %v1003_v56 }
0x1365   :  { %v1223_v11 = vmax.f32 %v1114_v12, 0.0  ;;  %v1224_v19 = vmax.f32 %v1116_v4, 0.0 }
0x1366   :  { %v1008_v8 = vpop.permute.xlu1 %1007 }
0x1367   :  { %v1120_v14 = vadd.f32 %v1119_v6, %v1008_v8  ;;  %v1122_v21 = vadd.f32 %v1121_v13, %v1008_v8  ;;  %v1849_v26 = vpack.c.bf16 %v1223_v11, %v1219_v2  ;;  %v1847_v27 = vpack.c.bf16 %v1224_v19, %v1220_v5 }
0x1368   :  { %v1237_v6 = vcombine.high %v2259_v18, %v2259_v18  ;;  %v1402_v18 = vld [vmem:[%s2329_s9] sm:$0xff] }
0x1369   :  { %v1227_v23 = vmax.f32 %v1120_v14, 0.0  ;;  %v1228_v30 = vmax.f32 %v1122_v21, 0.0  ;;  %1848 = vmatprep.subr.bf16.mxu1 %v1847_v27  ;;  %v1398_v27 = vld [vmem:[%s2328_s8] sm:$0xff] }
0x136a   :  { %1850 = vmatpush1.bf16.xpose.msra.mxu1 %v1849_v26 }
0x136b   :  { %v1853_v34 = vpack.c.bf16 %v1231_v17, %v1227_v23  ;;  %v1851_v35 = vpack.c.bf16 %v1232_v32, %v1228_v30  ;;  %v1404_v23 = vld [vmem:[%s2329_s9 + $0x10] sm:$0xff]  ;;  %v1870_v30 = vpack.c.bf16 %v1399_v29, %v1398_v27  ;;  %v1401_v17 = vld [vmem:[%s2328_s8 + $0x18] sm:$0xff] }
0x136d   :  { %1852 = vmatprep.subr.bf16.mxu1 %v1851_v35 }
0x1372   :  { %1854 = vmatpush1.bf16.xpose.msra.mxu1 %v1853_v34 }
0x1379   :  { %1323 = vmatmul.mubr.f32.vlgmr.msra.gmra.mrb[16].mxu1 %v1244_v31  ;;  %v1400_v31 = vld [vmem:[%s2328_s8 + $0x10] sm:$0xff] }
0x137a   :  { %v1873_v34 = vpack.c.bf16 %v1401_v17, %v1400_v31 }
0x1425   :  { %v944_v36 = vpop.f32.mrb[8].mxu0 }
0x1426   :  { %v949_v37 = vrot.slane %v944_v36, 2  ;;  %v1760_v38 = vpop.f32.mrb[9].mxu0 }
0x1428   :  { %v951_v39 = vadd.f32 %v949_v37, %v2100_v15 }
0x1429   :  { %v1196_v40 = vpop.f32.mrb[10].mxu0 }
0x142a   :  { %1945 = vtanh.f32 %v951_v39  ;;  %v1197_v41 = vadd.f32 %v1196_v40, %v998_v58  ;;  %v1198_v42 = vpop.f32.mrb[11].mxu0  ;;  %v1596_v2 = vmul.f32 -1.442695, %v951_v39 }
0x142b   :  { %v1199_v43 = vadd.f32 %v1198_v42, %v998_v58  ;;  %v1611_v42 = vld [vmem:[%s2330_s10] ss:$0 sm:$0xff] }
0x142c   :  { %v1221_v45 = vmax.f32 %v1197_v41, 0.0  ;;  %1947 = vpow2.f32 %v1596_v2 }
0x142d   :  { %v1202_v44 = vpop.f32.mrb[12].mxu0  ;;  %v1222_v48 = vmax.f32 %v1199_v43, 0.0 }
0x142e   :  { %v1203_v46 = vadd.f32 %v1202_v44, %v1003_v56  ;;  %v1204_v47 = vpop.f32.mrb[13].mxu0 }
0x142f   :  { %v1205_v49 = vadd.f32 %v1204_v47, %v1003_v56 }
0x1430   :  { %v1225_v50 = vmax.f32 %v1203_v46, 0.0 }
0x1431   :  { %v1226_v51 = vmax.f32 %v1205_v49, 0.0  ;;  %v1208_v52 = vpop.f32.mrb[14].mxu0 }
0x1432   :  { %v1857_v53 = vpack.c.bf16 %v1225_v50, %v1221_v45  ;;  %v1209_v54 = vadd.f32 %v1208_v52, %v1008_v8  ;;  %v1210_v55 = vpop.f32.mrb[15].mxu0 }
0x1433   :  { %v1855_v57 = vpack.c.bf16 %v1226_v51, %v1222_v48  ;;  %v1211_v59 = vadd.f32 %v1210_v55, %v1008_v8  ;;  %v1251_v8 = vrot.slane %v1237_v6, %v2261_v22  ;;  %v1403_v22 = vld [vmem:[%s2329_s9 + $0x8] sm:$0xff] }
0x1434   :  { %v1946_v15 = vpop.eup %1945  ;;  %v1229_v58 = vmax.f32 %v1209_v54, 0.0  ;;  %v1864_v24 = vpack.c.bf16 %v1403_v22, %v1402_v18 }
0x1435   :  { %964 = vrot.lane.b32.xlu1 %v1946_v15, %s1980_s13  ;;  %v1214_v60 = vpop.f32.mrb[16].mxu0  ;;  %1856 = vmatprep.subr.bf16.mxu1 %v1855_v57  ;;  %v1230_v62 = vmax.f32 %v1211_v59, 0.0  ;;  %v1253_v9 = vcombine.high %v1251_v8, %v1251_v8 }
0x1436   :  { %v1215_v7 = vadd.f32 %v1214_v60, %v1013_v16  ;;  %v1216_v61 = vpop.f32.mrb[17].mxu0  ;;  %1858 = vmatpush1.bf16.xpose.msra.mxu1 %v1857_v53  ;;  %v1948_v4 = vpop.eup %1947  ;;  %1865 = vmatpush3.bf16.msra.mxu0 %v1864_v24 }
0x1437   :  { %v1217_v63 = vadd.f32 %v1216_v61, %v1013_v16  ;;  %v955_v5 = vadd.f32 1.0, %v1948_v4  ;;  %1392 = vmatprep.mubr.f32.mxu1 %v1253_v9  ;;  %v960_v16 = vrot.slane %v2172_v28, 6  ;;  %v1405_v28 = vld [vmem:[%s2329_s9 + $0x18] sm:$0xff]  ;;  %1866 = vmatprep.subr.bf16.mxu0 %v1977_v3 }
0x1438   :  { %v1233_v56 = vmax.f32 %v1215_v7, 0.0  ;;  %v1867_v25 = vpack.c.bf16 %v1405_v28, %v1404_v23 }
0x1439   :  { %v1234_v12 = vmax.f32 %v1217_v63, 0.0  ;;  %1949 = vrcp.f32 %v955_v5 }
0x143a   :  { %v1861_v0 = vpack.c.bf16 %v1233_v56, %v1229_v58  ;;  %1868 = vmatpush3.bf16.msra.mxu0 %v1867_v25 }
0x143b   :  { %v1859_v1 = vpack.c.bf16 %v1234_v12, %v1230_v62  ;;  %1869 = vmatprep.subr.bf16.mxu0 %v1977_v3 }
0x143d   :  { %1860 = vmatprep.subr.bf16.mxu1 %v1859_v1 }
0x143e   :  { %1862 = vmatpush1.bf16.xpose.msra.mxu1 %v1861_v0 }
0x1443   :  { %v1950_v11 = vpop.eup %1949 }
0x1444   :  { %v962_v19 = vmul.f32 %v1950_v11, %v960_v16 }
0x1445   :  { %1393 = vmatmul.mubr.f32.vlgmr.msra.gmra.mrb[16].mxu1 %v1251_v8 }
0x14a7   :  { %v965_v13 = vpop.permute.xlu1 %964 }
0x14a8   :  { %v967_v14 = vmul.f32 %v1950_v11, %v965_v13 }
0x14aa   :  { %969 = vrot.lane.b32.xlu0 %v967_v14, %s1981_s3 }
0x1518   :  { %v1394_v32 = vpop.f32.mrb[16].mxu1 }
0x1519   :  { %v1396_v33 = vpop.f32.mrb[17].mxu1  ;;  %1770 = vmatmul.mubr.msk.f32.vlgmr.msra.gmra.mrb[18].mxu0 %vm136_vm2, %v1394_v32 }
0x151a   :  { %1871 = vmatpush3.bf16.msra.mxu0 %v1870_v30  ;;  %1780 = vmatprep.mubr.msk.f32.mxu0 %vm1978_vm1, %v1979_v10 }
0x151b   :  { %1872 = vmatprep.subr.bf16.mxu0 %v1977_v3 }
0x151c   :  { %v970_v20 = vpop.permute.xlu0 %969 }
0x151d   :  { %v972_v21 = vadd.f32 %v970_v20, %v962_v19 }
0x151e   :  { %1874 = vmatpush3.bf16.msra.mxu0 %v1873_v34 }
0x151f   :  { %1951 = vtanh.f32 %v972_v21 }
0x1529   :  { %v1952_v26 = vpop.eup %1951 }
0x152a   :  { %975 = vrot.lane.b32.xlu1 %v1952_v26, %s1980_s13 }
0x159c   :  { %v976_v35 = vpop.permute.xlu1 %975 }
0x159d   :  { %v978_v36 = vmul.f32 %v1950_v11, %v976_v35 }
0x159f   :  { %v1480_v37 = vrot.slane %v978_v36, 6 }
0x15a1   :  { %1481 = vrot.lane.b32.xlu0 %v1480_v37, %s1981_s3 }
0x15ec   :  { %v1475_v39 = vpop.f32.mrb[18].mxu0 }
0x15ed   :  { %v1771_v40 = vpop.f32.mrb[19].mxu0 }
0x1613   :  { %v1482_v38 = vpop.permute.xlu0 %1481 }
0x1614   :  { %1781 = vmatmul.mubr.msk.f32.vlgmr.msra.gmra.mrb[20].mxu0 %vm136_vm2, %v1482_v38 }
0x16e7   :  { %v1551_v41 = vpop.f32.mrb[20].mxu0 }
0x16e8   :  { %v1552_v10 = vadd.f32 %v1551_v41, %v1475_v39  ;;  %v1782_v3 = vpop.f32.mrb[21].mxu0 }
0x16ea   :  { %v1562_v43 = vadd.f32 %v1611_v42, %v1552_v10 }
0x16ec   :  { %1564 = vst.msk [vmem:[#allocation2] sm:$0x3] %vm1563_vm7, %v1562_v43 }
0x16ed   :  { %1964 = shalt.err (!%p1961_p4)
}
0x16ee   :  { %s1965_s20 = scalar_lea.hbm %s2331_s11, 32 }
0x16ef   :  { %p1966_p5 = scmp.ne.s32.totalorder %s2331_s11, %s1965_s20  ;;  %p1969_p6 = scmp.lt.u32.totalorder %s1965_s20, %s2331_s11 }
0x16f1   :  { %p1971_p7 = pnand %p1969_p6, %p1966_p5 }
0x16f3   :  { %1974 = shalt.err (!%p1971_p7)
}
0x16f4   :  { %1574 = dma.vmem_to_hbm [thread:$0]  %s1572_s18, 32, %s2331_s11, [#allocation3]  }
0x16f5   :  { %1975 = dma.done.wait [#allocation3], 32  }
0x16f6   :  { %1976 = vsyncadd [#allocation3], 4294967264 }
0x16f7   :  { %1578 = vsyncpa [#allocation3], 1 }

</bundles_post_ra>
